<compile_context>
chip_gen: v6e
topology: v6e:2x2x1
jax: 0.10.0
libtpu: 0.0.40
codegen_flags: <defaults>
</compile_context>

<pallas_src>
import math

import jax
import jax.numpy as jnp
from jax.experimental import pallas as pl
from jax.experimental.pallas import tpu as pltpu

# ------------------------- small config (synthetic) -------------------------
VOCAB = 64    # vocabulary size
B = 2         # batch
L = 8         # title length (sequence)
E = 32        # word_embedding_dim
H = 4         # num_attention_heads
DH = E // H   # head dim
Q = 16        # query_vector_dim
BL = B * L
DROPOUT_P = 0.2   # identity at inference (training=False)

# packed-slab column offsets
_QKV = 3 * E            # end of the fused Q|K|V weight block        (96)
_WO_END = 4 * E         # end of the output-projection weight block  (128)
_AW_END = 4 * E + Q     # end of the additive-attention linear block (144)
_AQ_END = 4 * E + 2 * Q # end of the additive-attention query (bias slab only, 160)


def _recip(d):
    # EUP approximate reciprocal + one Newton refinement step: keeps the
    # softmax normalisation within the 1e-5 tolerance while leaving the VPU
    # divide path free.
    r = pl.reciprocal(d, approx=True)
    return r * (2.0 - d * r)


# ------------------------------- Pallas kernel ------------------------------
def news_encoder_kernel(ids_ref, emb_ref, w_ref, b_ref, o_ref):
    # ---- embedding lookup fused as an exact one-hot MXU matmul ----
    ids = ids_ref[...]                                               # (BL, 1) int32
    iota = jax.lax.broadcasted_iota(jnp.int32, (BL, VOCAB), 1)       # (BL, VOCAB)
    onehot = jnp.where(ids == iota, 1.0, 0.0)                        # (BL, VOCAB) f32
    x = jnp.dot(onehot, emb_ref[...],
                preferred_element_type=jnp.float32)                  # (BL, E)
    # dropout(p=0.2) is identity at inference.

    # ---- nn.MultiheadAttention: fused QKV projection (scale folded into Q) ----
    qkv = (jnp.dot(x, w_ref[:, :_QKV], preferred_element_type=jnp.float32)
           + b_ref[:, :_QKV])                                        # (BL, 3E)

    # Restack heads onto a single leading batch dim (H*B).  Only static lane
    # slices + major-dim concats/reshapes (no 4-D transposes / minor-dim splits).
    def heads(off):
        parts = [qkv[:, off + h * DH: off + (h + 1) * DH].reshape(1, B, L, DH)
                 for h in range(H)]
        return jnp.concatenate(parts, axis=0).reshape(H * B, L, DH)

    q = heads(0)           # (H*B, L, DH)
    k = heads(E)
    v = heads(2 * E)

    # One batched attention over all (head, batch) pairs.
    s = jnp.einsum('nld,nmd->nlm', q, k,
                   preferred_element_type=jnp.float32)               # (HB, L, L)
    s = s - jnp.max(s, axis=-1, keepdims=True)
    p = jnp.exp(s)
    p = p * _recip(jnp.sum(p, axis=-1, keepdims=True))
    a = jnp.einsum('nlm,nmd->nld', p, v,
                   preferred_element_type=jnp.float32)               # (HB, L, DH)

    # Lane re-concat of heads + single output projection matmul.
    a_cat = jnp.concatenate(
        [a[h * B:(h + 1) * B].reshape(BL, DH) for h in range(H)], axis=-1)  # (BL, E)
    ctx = (jnp.dot(a_cat, w_ref[:, _QKV:_WO_END],
                   preferred_element_type=jnp.float32)
           + b_ref[:, _QKV:_WO_END])                                 # (BL, E)
    # dropout after MHA: identity at inference.

    # ---- AdditiveAttention(query_vector_dim=Q, candidate_dim=E) ----
    t = jnp.tanh(jnp.dot(ctx, w_ref[:, _WO_END:_AW_END],
                         preferred_element_type=jnp.float32)
                 + b_ref[:, _WO_END:_AW_END])                        # (BL, Q)
    sc = jnp.sum(t * b_ref[:, _AW_END:_AQ_END], axis=-1, keepdims=True)  # (BL, 1)
    sc = sc.reshape(B, L, 1)
    sc = sc - jnp.max(sc, axis=1, keepdims=True)
    w = jnp.exp(sc)
    w = w * _recip(jnp.sum(w, axis=1, keepdims=True))                # (B, L, 1)
    o_ref[...] = jnp.sum(w * ctx.reshape(B, L, E), axis=1)           # (B, E) single store


# --------------------------------- wrapper -----------------------------------
def news_encoder(title, word_emb, in_proj_w, in_proj_b, out_proj_w, out_proj_b,
                 add_lin_w, add_lin_b, add_query):
    """title: (B, L) int32 token ids.  Params in their PyTorch layouts.  Returns (B, E)."""
    scale = 1.0 / math.sqrt(DH)

    # Fold 1/sqrt(DH) into the Q block of the fused in-projection.
    w_in = jnp.concatenate([in_proj_w[:E] * scale, in_proj_w[E:]], axis=0)   # (3E, E)
    b_in = jnp.concatenate([in_proj_b[:E] * scale, in_proj_b[E:]], axis=0)   # (3E,)

    # Two packed operands: weight slab (E, 4E+Q) and bias/vector slab (1, 4E+2Q).
    w_slab = jnp.concatenate([w_in.T, out_proj_w.T, add_lin_w.T], axis=1)    # (E, 144)
    b_slab = jnp.concatenate([b_in, out_proj_b, add_lin_b, add_query])[None, :]  # (1, 160)

    ids = title.reshape(B * L, 1).astype(jnp.int32)                          # (BL, 1)

    vmem = lambda: pl.BlockSpec(memory_space=pltpu.MemorySpace.VMEM)
    return pl.pallas_call(
        news_encoder_kernel,
        out_shape=jax.ShapeDtypeStruct((B, E), jnp.float32),
        in_specs=[vmem(), vmem(), vmem(), vmem()],
        out_specs=vmem(),
    )(ids, word_emb, w_slab, b_slab)


# ------------------------------ JAX reference --------------------------------
def reference(title, word_emb, in_w, in_b, out_w, out_b, add_w, add_b, add_q):
    x = jnp.take(word_emb, title, axis=0)                         # (B, L, E)
    qkv = x @ in_w.T + in_b                                       # (B, L, 3E)
    q, k, v = qkv[..., :E], qkv[..., E:2 * E], qkv[..., 2 * E:]

    def split(z):  # (B, L, E) -> (B, H, L, DH)
        return z.reshape(B, L, H, DH).transpose(0, 2, 1, 3)

    qh, kh, vh = split(q), split(k), split(v)
    s = jnp.einsum('bhld,bhmd->bhlm', qh, kh) / math.sqrt(DH)
    p = jax.nn.softmax(s, axis=-1)
    a = jnp.einsum('bhlm,bhmd->bhld', p, vh)
    a = a.transpose(0, 2, 1, 3).reshape(B, L, E)
    ctx = a @ out_w.T + out_b                                     # (B, L, E)
    t = jnp.tanh(ctx @ add_w.T + add_b)                           # (B, L, Q)
    sc = jnp.einsum('blq,q->bl', t, add_q)
    w = jax.nn.softmax(sc, axis=-1)
    return jnp.einsum('bl,ble->be', w, ctx)


# ---------------------------------- main -------------------------------------
if __name__ == "__main__":
    key = jax.random.PRNGKey(0)
    keys = jax.random.split(key, 8)

    # Deterministic synthetic parameters (shapes from the nn module __init__).
    word_emb = jax.random.normal(keys[0], (VOCAB, E), jnp.float32) * 0.1
    word_emb = word_emb.at[0].set(0.0)  # padding_idx=0

    in_proj_w = jax.random.normal(keys[1], (3 * E, E), jnp.float32) * 0.1   # (3E, E)
    in_proj_b = jax.random.normal(keys[2], (3 * E,), jnp.float32) * 0.1
    out_proj_w = jax.random.normal(keys[3], (E, E), jnp.float32) * 0.1      # (E, E)
    out_proj_b = jax.random.normal(keys[4], (E,), jnp.float32) * 0.1
    add_lin_w = jax.random.normal(keys[5], (Q, E), jnp.float32) * 0.1       # Linear(E -> Q)
    add_lin_b = jax.random.normal(keys[6], (Q,), jnp.float32) * 0.1
    add_query = jax.random.uniform(keys[7], (Q,), jnp.float32, -0.1, 0.1)

    # Input: token ids (B, L) — the embedding gather is fused into the kernel.
    title = jax.random.randint(jax.random.PRNGKey(42), (B, L), 0, VOCAB, jnp.int32)

    out = news_encoder(title, word_emb, in_proj_w, in_proj_b, out_proj_w,
                       out_proj_b, add_lin_w, add_lin_b, add_query)
    out = jax.block_until_ready(out)

    ref = reference(title, word_emb, in_proj_w, in_proj_b, out_proj_w,
                    out_proj_b, add_lin_w, add_lin_b, add_query)
    assert out.shape == (B, E)
    assert jnp.allclose(out, ref, atol=1e-5, rtol=1e-5), "mismatch vs JAX reference"

    print("KERNEL_OK")
</pallas_src>

<mosaic_0001>
module attributes {stable_mosaic.version = 11 : i64} {
  func.func @news_encoder_kernel(%arg0: memref<16x1xi32, #tpu.memory_space<vmem>>, %arg1: memref<64x32xf32, #tpu.memory_space<vmem>>, %arg2: memref<32x144xf32, #tpu.memory_space<vmem>>, %arg3: memref<1x160xf32, #tpu.memory_space<vmem>>, %arg4: memref<2x32xf32, #tpu.memory_space<vmem>>) attributes {dimension_semantics = [], scalar_prefetch = 0 : i64, scratch_operands = 0 : i64, tpu.core_type = #tpu.core_type<tc>} {
    %c0 = arith.constant 0 : index
    %c0_0 = arith.constant 0 : index
    %0 = vector.load %arg0[%c0, %c0_0] : memref<16x1xi32, #tpu.memory_space<vmem>>, vector<16x1xi32>
    %1 = tpu.iota {dimensions = array<i32: 1>} : vector<16x64xi32>
    %2 = vector.broadcast %0 : vector<16x1xi32> to vector<16x64xi32>
    %3 = arith.cmpi eq, %2, %1 : vector<16x64xi32>
    %cst = arith.constant 1.000000e+00 : f32
    %cst_1 = arith.constant 0.000000e+00 : f32
    %4 = vector.broadcast %cst : f32 to vector<16x64xf32>
    %5 = vector.broadcast %cst_1 : f32 to vector<16x64xf32>
    %6 = arith.select %3, %4, %5 : vector<16x64xi1>, vector<16x64xf32>
    %c0_2 = arith.constant 0 : index
    %c0_3 = arith.constant 0 : index
    %7 = vector.load %arg1[%c0_2, %c0_3] : memref<64x32xf32, #tpu.memory_space<vmem>>, vector<64x32xf32>
    %cst_4 = arith.constant dense<0.000000e+00> : vector<16x32xf32>
    %8 = tpu.matmul %6, %7, %cst_4 {dimension_numbers = #tpu.dot_dimension_numbers<[1], [0], [0], [1], [0, 0, 1, 1], [], []>} : vector<16x64xf32>, vector<64x32xf32>, vector<16x32xf32> -> vector<16x32xf32>
    %c0_5 = arith.constant 0 : index
    %c0_6 = arith.constant 0 : index
    %9 = vector.load %arg2[%c0_5, %c0_6] : memref<32x144xf32, #tpu.memory_space<vmem>>, vector<32x96xf32>
    %cst_7 = arith.constant dense<0.000000e+00> : vector<16x96xf32>
    %10 = tpu.matmul %8, %9, %cst_7 {dimension_numbers = #tpu.dot_dimension_numbers<[1], [0], [0], [1], [0, 0, 1, 1], [], []>} : vector<16x32xf32>, vector<32x96xf32>, vector<16x96xf32> -> vector<16x96xf32>
    %c0_8 = arith.constant 0 : index
    %c0_9 = arith.constant 0 : index
    %11 = vector.load %arg3[%c0_8, %c0_9] : memref<1x160xf32, #tpu.memory_space<vmem>>, vector<1x96xf32>
    %12 = vector.broadcast %11 : vector<1x96xf32> to vector<16x96xf32>
    %13 = arith.addf %10, %12 : vector<16x96xf32>
    %14 = vector.extract_strided_slice %13 {offsets = [0, 0], sizes = [16, 8], strides = [1, 1]} : vector<16x96xf32> to vector<16x8xf32>
    %15 = vector.shape_cast %14 : vector<16x8xf32> to vector<1x2x8x8xf32>
    %16 = vector.extract_strided_slice %13 {offsets = [0, 8], sizes = [16, 8], strides = [1, 1]} : vector<16x96xf32> to vector<16x8xf32>
    %17 = vector.shape_cast %16 : vector<16x8xf32> to vector<1x2x8x8xf32>
    %18 = vector.extract_strided_slice %13 {offsets = [0, 16], sizes = [16, 8], strides = [1, 1]} : vector<16x96xf32> to vector<16x8xf32>
    %19 = vector.shape_cast %18 : vector<16x8xf32> to vector<1x2x8x8xf32>
    %20 = vector.extract_strided_slice %13 {offsets = [0, 24], sizes = [16, 8], strides = [1, 1]} : vector<16x96xf32> to vector<16x8xf32>
    %21 = vector.shape_cast %20 : vector<16x8xf32> to vector<1x2x8x8xf32>
    %22 = tpu.concatenate %15, %17, %19, %21 in 0 : vector<1x2x8x8xf32>, vector<1x2x8x8xf32>, vector<1x2x8x8xf32>, vector<1x2x8x8xf32> -> vector<4x2x8x8xf32>
    %23 = vector.shape_cast %22 : vector<4x2x8x8xf32> to vector<8x8x8xf32>
    %24 = vector.extract_strided_slice %13 {offsets = [0, 32], sizes = [16, 8], strides = [1, 1]} : vector<16x96xf32> to vector<16x8xf32>
    %25 = vector.shape_cast %24 : vector<16x8xf32> to vector<1x2x8x8xf32>
    %26 = vector.extract_strided_slice %13 {offsets = [0, 40], sizes = [16, 8], strides = [1, 1]} : vector<16x96xf32> to vector<16x8xf32>
    %27 = vector.shape_cast %26 : vector<16x8xf32> to vector<1x2x8x8xf32>
    %28 = vector.extract_strided_slice %13 {offsets = [0, 48], sizes = [16, 8], strides = [1, 1]} : vector<16x96xf32> to vector<16x8xf32>
    %29 = vector.shape_cast %28 : vector<16x8xf32> to vector<1x2x8x8xf32>
    %30 = vector.extract_strided_slice %13 {offsets = [0, 56], sizes = [16, 8], strides = [1, 1]} : vector<16x96xf32> to vector<16x8xf32>
    %31 = vector.shape_cast %30 : vector<16x8xf32> to vector<1x2x8x8xf32>
    %32 = tpu.concatenate %25, %27, %29, %31 in 0 : vector<1x2x8x8xf32>, vector<1x2x8x8xf32>, vector<1x2x8x8xf32>, vector<1x2x8x8xf32> -> vector<4x2x8x8xf32>
    %33 = vector.shape_cast %32 : vector<4x2x8x8xf32> to vector<8x8x8xf32>
    %34 = vector.extract_strided_slice %13 {offsets = [0, 64], sizes = [16, 8], strides = [1, 1]} : vector<16x96xf32> to vector<16x8xf32>
    %35 = vector.shape_cast %34 : vector<16x8xf32> to vector<1x2x8x8xf32>
    %36 = vector.extract_strided_slice %13 {offsets = [0, 72], sizes = [16, 8], strides = [1, 1]} : vector<16x96xf32> to vector<16x8xf32>
    %37 = vector.shape_cast %36 : vector<16x8xf32> to vector<1x2x8x8xf32>
    %38 = vector.extract_strided_slice %13 {offsets = [0, 80], sizes = [16, 8], strides = [1, 1]} : vector<16x96xf32> to vector<16x8xf32>
    %39 = vector.shape_cast %38 : vector<16x8xf32> to vector<1x2x8x8xf32>
    %40 = vector.extract_strided_slice %13 {offsets = [0, 88], sizes = [16, 8], strides = [1, 1]} : vector<16x96xf32> to vector<16x8xf32>
    %41 = vector.shape_cast %40 : vector<16x8xf32> to vector<1x2x8x8xf32>
    %42 = tpu.concatenate %35, %37, %39, %41 in 0 : vector<1x2x8x8xf32>, vector<1x2x8x8xf32>, vector<1x2x8x8xf32>, vector<1x2x8x8xf32> -> vector<4x2x8x8xf32>
    %43 = vector.shape_cast %42 : vector<4x2x8x8xf32> to vector<8x8x8xf32>
    "tpu.trace_start"() <{level = 10 : i32, message = "nld,nmd->nlm"}> : () -> ()
    %cst_10 = arith.constant dense<0.000000e+00> : vector<8x8x8xf32>
    %44 = tpu.matmul %23, %33, %cst_10 {dimension_numbers = #tpu.dot_dimension_numbers<[2], [2], [1], [1], [0, 0, 0, 1, 1, 1], [0], [0]>} : vector<8x8x8xf32>, vector<8x8x8xf32>, vector<8x8x8xf32> -> vector<8x8x8xf32>
    "tpu.trace_stop"() : () -> ()
    %cst_11 = arith.constant dense<0xFF800000> : vector<8x8xf32>
    %45 = vector.multi_reduction <maximumf>, %44, %cst_11 [2] : vector<8x8x8xf32> to vector<8x8xf32>
    %46 = vector.shape_cast %45 : vector<8x8xf32> to vector<8x8x1xf32>
    %47 = vector.broadcast %46 : vector<8x8x1xf32> to vector<8x8x8xf32>
    %48 = arith.subf %44, %47 : vector<8x8x8xf32>
    %49 = math.exp %48 : vector<8x8x8xf32>
    %cst_12 = arith.constant dense<0.000000e+00> : vector<8x8xf32>
    %50 = vector.multi_reduction <add>, %49, %cst_12 [2] : vector<8x8x8xf32> to vector<8x8xf32>
    %51 = vector.shape_cast %50 : vector<8x8xf32> to vector<8x8x1xf32>
    %52 = tpu.reciprocal %51 {approx = true} : vector<8x8x1xf32> -> vector<8x8x1xf32>
    %53 = arith.mulf %51, %52 : vector<8x8x1xf32>
    %cst_13 = arith.constant 2.000000e+00 : f32
    %54 = vector.broadcast %cst_13 : f32 to vector<8x8x1xf32>
    %55 = arith.subf %54, %53 : vector<8x8x1xf32>
    %56 = arith.mulf %52, %55 : vector<8x8x1xf32>
    %57 = vector.broadcast %56 : vector<8x8x1xf32> to vector<8x8x8xf32>
    %58 = arith.mulf %49, %57 : vector<8x8x8xf32>
    "tpu.trace_start"() <{level = 10 : i32, message = "nlm,nmd->nld"}> : () -> ()
    %cst_14 = arith.constant dense<0.000000e+00> : vector<8x8x8xf32>
    %59 = tpu.matmul %58, %43, %cst_14 {dimension_numbers = #tpu.dot_dimension_numbers<[2], [1], [1], [2], [0, 0, 0, 1, 1, 2], [0], [0]>} : vector<8x8x8xf32>, vector<8x8x8xf32>, vector<8x8x8xf32> -> vector<8x8x8xf32>
    "tpu.trace_stop"() : () -> ()
    %60 = vector.extract_strided_slice %59 {offsets = [0, 0, 0], sizes = [2, 8, 8], strides = [1, 1, 1]} : vector<8x8x8xf32> to vector<2x8x8xf32>
    %61 = vector.shape_cast %60 : vector<2x8x8xf32> to vector<16x8xf32>
    %62 = vector.extract_strided_slice %59 {offsets = [2, 0, 0], sizes = [2, 8, 8], strides = [1, 1, 1]} : vector<8x8x8xf32> to vector<2x8x8xf32>
    %63 = vector.shape_cast %62 : vector<2x8x8xf32> to vector<16x8xf32>
    %64 = vector.extract_strided_slice %59 {offsets = [4, 0, 0], sizes = [2, 8, 8], strides = [1, 1, 1]} : vector<8x8x8xf32> to vector<2x8x8xf32>
    %65 = vector.shape_cast %64 : vector<2x8x8xf32> to vector<16x8xf32>
    %66 = vector.extract_strided_slice %59 {offsets = [6, 0, 0], sizes = [2, 8, 8], strides = [1, 1, 1]} : vector<8x8x8xf32> to vector<2x8x8xf32>
    %67 = vector.shape_cast %66 : vector<2x8x8xf32> to vector<16x8xf32>
    %68 = tpu.concatenate %61, %63, %65, %67 in 1 : vector<16x8xf32>, vector<16x8xf32>, vector<16x8xf32>, vector<16x8xf32> -> vector<16x32xf32>
    %c0_15 = arith.constant 0 : index
    %c96 = arith.constant 96 : index
    %69 = vector.load %arg2[%c0_15, %c96] : memref<32x144xf32, #tpu.memory_space<vmem>>, vector<32x32xf32>
    %cst_16 = arith.constant dense<0.000000e+00> : vector<16x32xf32>
    %70 = tpu.matmul %68, %69, %cst_16 {dimension_numbers = #tpu.dot_dimension_numbers<[1], [0], [0], [1], [0, 0, 1, 1], [], []>} : vector<16x32xf32>, vector<32x32xf32>, vector<16x32xf32> -> vector<16x32xf32>
    %c0_17 = arith.constant 0 : index
    %c96_18 = arith.constant 96 : index
    %71 = vector.load %arg3[%c0_17, %c96_18] : memref<1x160xf32, #tpu.memory_space<vmem>>, vector<1x32xf32>
    %72 = vector.broadcast %71 : vector<1x32xf32> to vector<16x32xf32>
    %73 = arith.addf %70, %72 : vector<16x32xf32>
    %c0_19 = arith.constant 0 : index
    %c128 = arith.constant 128 : index
    %74 = vector.load %arg2[%c0_19, %c128] : memref<32x144xf32, #tpu.memory_space<vmem>>, vector<32x16xf32>
    %cst_20 = arith.constant dense<0.000000e+00> : vector<16x16xf32>
    %75 = tpu.matmul %73, %74, %cst_20 {dimension_numbers = #tpu.dot_dimension_numbers<[1], [0], [0], [1], [0, 0, 1, 1], [], []>} : vector<16x32xf32>, vector<32x16xf32>, vector<16x16xf32> -> vector<16x16xf32>
    %c0_21 = arith.constant 0 : index
    %c128_22 = arith.constant 128 : index
    %76 = vector.load %arg3[%c0_21, %c128_22] : memref<1x160xf32, #tpu.memory_space<vmem>>, vector<1x16xf32>
    %77 = vector.broadcast %76 : vector<1x16xf32> to vector<16x16xf32>
    %78 = arith.addf %75, %77 : vector<16x16xf32>
    %79 = math.tanh %78 : vector<16x16xf32>
    %c0_23 = arith.constant 0 : index
    %c144 = arith.constant 144 : index
    %80 = vector.load %arg3[%c0_23, %c144] : memref<1x160xf32, #tpu.memory_space<vmem>>, vector<1x16xf32>
    %81 = vector.broadcast %80 : vector<1x16xf32> to vector<16x16xf32>
    %82 = arith.mulf %79, %81 : vector<16x16xf32>
    %cst_24 = arith.constant dense<0.000000e+00> : vector<16xf32>
    %83 = vector.multi_reduction <add>, %82, %cst_24 [1] : vector<16x16xf32> to vector<16xf32>
    %84 = vector.shape_cast %83 : vector<16xf32> to vector<16x1xf32>
    %85 = vector.shape_cast %84 : vector<16x1xf32> to vector<2x8x1xf32>
    %cst_25 = arith.constant dense<0xFF800000> : vector<2x1xf32>
    %86 = vector.multi_reduction <maximumf>, %85, %cst_25 [1] : vector<2x8x1xf32> to vector<2x1xf32>
    %87 = vector.shape_cast %86 : vector<2x1xf32> to vector<2x1x1xf32>
    %88 = vector.broadcast %87 : vector<2x1x1xf32> to vector<2x8x1xf32>
    %89 = arith.subf %85, %88 : vector<2x8x1xf32>
    %90 = math.exp %89 : vector<2x8x1xf32>
    %cst_26 = arith.constant dense<0.000000e+00> : vector<2x1xf32>
    %91 = vector.multi_reduction <add>, %90, %cst_26 [1] : vector<2x8x1xf32> to vector<2x1xf32>
    %92 = vector.shape_cast %91 : vector<2x1xf32> to vector<2x1x1xf32>
    %93 = tpu.reciprocal %92 {approx = true} : vector<2x1x1xf32> -> vector<2x1x1xf32>
    %94 = arith.mulf %92, %93 : vector<2x1x1xf32>
    %cst_27 = arith.constant 2.000000e+00 : f32
    %95 = vector.broadcast %cst_27 : f32 to vector<2x1x1xf32>
    %96 = arith.subf %95, %94 : vector<2x1x1xf32>
    %97 = arith.mulf %93, %96 : vector<2x1x1xf32>
    %98 = vector.broadcast %97 : vector<2x1x1xf32> to vector<2x8x1xf32>
    %99 = arith.mulf %90, %98 : vector<2x8x1xf32>
    %100 = vector.shape_cast %73 : vector<16x32xf32> to vector<2x8x32xf32>
    %101 = vector.broadcast %99 : vector<2x8x1xf32> to vector<2x8x32xf32>
    %102 = arith.mulf %101, %100 : vector<2x8x32xf32>
    %cst_28 = arith.constant dense<0.000000e+00> : vector<2x32xf32>
    %103 = vector.multi_reduction <add>, %102, %cst_28 [1] : vector<2x8x32xf32> to vector<2x32xf32>
    %c0_29 = arith.constant 0 : index
    %c0_30 = arith.constant 0 : index
    %104 = vector.load %arg4[%c0_29, %c0_30] : memref<2x32xf32, #tpu.memory_space<vmem>>, vector<2x32xf32>
    tpu.vector_store %arg4[%c0_29, %c0_30], %103 {strides = array<i32>} : memref<2x32xf32, #tpu.memory_space<vmem>>, vector<2x32xf32>,
    return
  }
}

</mosaic_0001>

<bundles_post_ra>
// kernel: tpu_custom_call.1
= control target key start
LH: loop header
LB: loop body
LE: loop exit
PB: predicated region body
PF: predicated region fallthrough
CT: control target
= control target key end

     0   :  { %v2189_v2 = vmov 0   ;;  %s2525_s0 = inlined_call_operand.vmem [shape: s32[16,1], index: 0, kind: input, shape index: {}]   ;;  %s2526_s1 = inlined_call_operand.vmem [shape: f32[64,32], index: 1, kind: input, shape index: {}]   ;;  %s2527_s2 = inlined_call_operand.vmem [shape: f32[32,144], index: 2, kind: input, shape index: {}]   ;;  %s2528_s3 = inlined_call_operand.vmem [shape: f32[1,160], index: 3, kind: input, shape index: {}]   ;;  %s2529_s4 = inlined_call_operand.hbm [shape: f32[2,32], index: 4, kind: output, shape index: {}]  }
   0x1   :  { %v18_v0 = vld [vmem:[%s2525_s0] sm:$0xff]  ;;  %v39_v1 = vld [vmem:[%s2526_s1 + $0x38] sm:$0xff]  ;;  %2122 = vset.pattern.permute.xlu0 %v2189_v2  ;;  %v38_v3 = vld [vmem:[%s2526_s1 + $0x30] sm:$0xff] }
   0x2   :  { %1977 = vmatprep.subr.mxu0 %v39_v1  ;;  %23 = vperm.xlu0 %2122, %v18_v0   ;;  %v37_v4 = vld [vmem:[%s2526_s1 + $0x28] sm:$0xff] }
   0x3   :  { %1978 = vmatpush3.msra.mxu0 %v39_v1  ;;  %v19_v5 = vld [vmem:[%s2525_s0 + $0x8] sm:$0xff] }
   0x4   :  { %1979 = vmatprep.subr.mxu0 %v38_v3 }
   0x5   :  { %9 = vsyncpa [#allocation3], 0  ;;  %1980 = vmatpush3.msra.mxu0 %v38_v3  ;;  %v36_v6 = vld [vmem:[%s2526_s1 + $0x20] sm:$0xff]  ;;  %v2248_v7 = vld [vmem:[%s2527_s2 + $0x30] sm:$0xff]  ;;  %v2190_v13 = vmov 0.0   ;;  %v20_v14 = vlaneseq  ;;  %vm40_vm0 = vcmask 523264  }
   0x6   :  { %1981 = vmatprep.subr.mxu0 %v37_v4  ;;  %1996 = vmatprep.subr.mxu1 %v2248_v7  ;;  %v2254_v8 = vld [vmem:[%s2527_s2 + $0x20] sm:$0xff]  ;;  %v35_v9 = vld [vmem:[%s2526_s1 + $0x18] sm:$0xff]  ;;  %v34_v10 = vld [vmem:[%s2526_s1 + $0x10] sm:$0xff]  ;;  %vm133_vm3 = vcmask 261120   ;;  %vm2191_vm4 = vmmov 0   ;;  %s2192_s17 = smov 112  }
   0x7   :  { %26 = vperm.xlu0 %2122, %v19_v5   ;;  %1982 = vmatpush3.msra.mxu0 %v37_v4  ;;  %v33_v11 = vld [vmem:[%s2526_s1 + $0x8] sm:$0xff]  ;;  %v32_v12 = vld [vmem:[%s2526_s1] sm:$0xff]  ;;  %v21_v15 = vand.u32 127, %v20_v14  ;;  %v2277_v20 = vld [vmem:[%s2527_s2 + $0x10] sm:$0xff]  ;;  %s2193_s18 = smov 120   ;;  %s2194_s19 = smov 104  }
   0x8   :  { %1983 = vmatprep.subr.mxu0 %v36_v6  ;;  %1997 = vmatpush3.msra.mxu1 %v2248_v7  ;;  %v2284_v21 = vld [vmem:[%s2527_s2] sm:$0xff]  ;;  %s2195_s20 = smov 96   ;;  %vm231_vm5 = vcmask 64512   ;;  %s2196_s21 = smov 64   ;;  %vm1584_vm6 = vcmask 130048   ;;  %vm1587_vm7 = vcmask 195584  }
   0x9   :  { %1984 = vmatpush3.msra.mxu0 %v36_v6  ;;  %1998 = vmatprep.subr.mxu1 %v2254_v8  ;;  %v2294_v25 = vld [vmem:[%s2528_s3] ss:$0 sm:$0xff]  ;;  %s2197_s22 = smov 32   ;;  %s2198_s23 = smov 8   ;;  %vm1863_vm8 = vcmask 1041409   ;;  %vm1866_vm9 = vcmask 254976  }
   0xa   :  { %1985 = vmatprep.subr.mxu0 %v35_v9  ;;  %1999 = vmatpush3.msra.mxu1 %v2254_v8  ;;  %s2199_s24 = smov 16   ;;  %s2200_s27 = smov 24  }
   0xb   :  { %1986 = vmatpush3.msra.mxu0 %v35_v9  ;;  %2000 = vmatprep.subr.mxu1 %v2277_v20 }
   0xc   :  { %1987 = vmatprep.subr.mxu0 %v34_v10  ;;  %2001 = vmatpush3.msra.mxu1 %v2277_v20 }
   0xd   :  { %1988 = vmatpush3.msra.mxu0 %v34_v10  ;;  %2002 = vmatprep.subr.mxu1 %v2284_v21 }
   0xe   :  { %1989 = vmatprep.subr.mxu0 %v33_v11  ;;  %2003 = vmatpush3.msra.mxu1 %v2284_v21 }
   0xf   :  { %1990 = vmatpush3.msra.mxu0 %v33_v11  ;;  %2007 = vmatprep.subr.mxu1 %v2190_v13 }
  0x10   :  { %1991 = vmatprep.subr.mxu0 %v32_v12 }
  0x11   :  { %1992 = vmatpush3.msra.mxu0 %v32_v12 }
  0x12   :  { %2017 = vmatprep.subr.mxu0 %v2190_v13 }
  0x7d   :  { %v24_v16 = vpop.permute.xlu0 %23 }
  0x7e   :  { %vm28_vm1 = vcmp.eq.s32.totalorder %v24_v16, %v21_v15 }
  0x7f   :  { %v30_v17 = vsel %vm28_vm1, 1.0, %v2190_v13 }
  0x80   :  { %1993 = vmatprep.mubr.msk.f32.mxu0 %vm40_vm0, %v30_v17 }
  0x82   :  { %v27_v18 = vpop.permute.xlu0 %26 }
  0x83   :  { %vm29_vm2 = vcmp.eq.s32.totalorder %v27_v18, %v21_v15 }
  0x84   :  { %v31_v19 = vsel %vm29_vm2, 1.0, %v2190_v13 }
  0x85   :  { %1994 = vmatmul.mubr.msk.f32.vlgmr.msra.gmra.mxu0 %vm40_vm0, %v31_v19 }
  0x86   :  { %2019 = vmatprep.mubr.msk.f32.mxu0 %vm2191_vm4, %v2190_v13 }
 0x145   :  { %v1995_v22 = vpop.f32.mrf.mxu0 }
 0x147   :  { %v113_v23 = vpop.f32.mrf.mxu0 }
 0x148   :  { %2004 = vmatprep.mubr.msk.f32.mxu1 %vm133_vm3, %v113_v23 }
 0x149   :  { %2005 = vmatmul.mubr.msk.f32.vlgmr.msra.gmra.mxu1 %vm133_vm3, %v1995_v22 }
 0x14a   :  { %2009 = vmatprep.mubr.msk.f32.mxu1 %vm2191_vm4, %v2190_v13 }
 0x209   :  { %v2006_v24 = vpop.f32.mrf.mxu1 }
 0x20a   :  { %v2307_v28 = vadd.f32 %v2006_v24, %v2294_v25 }
 0x20b   :  { %v206_v26 = vpop.f32.mrf.mxu1 }
 0x20c   :  { %v2301_v27 = vadd.f32 %v2294_v25, %v206_v26 }
 0x20e   :  { %221 = vrot.lane.b32.xlu0 %v2301_v27, %s2192_s17  ;;  %217 = vrot.lane.b32.xlu1 %v2301_v27, %s2193_s18 }
 0x212   :  { %225 = vrot.lane.b32.xlu0 %v2301_v27, %s2194_s19  ;;  %219 = vrot.lane.b32.xlu1 %v2307_v28, %s2193_s18 }
 0x216   :  { %229 = vrot.lane.b32.xlu0 %v2301_v27, %s2195_s20  ;;  %223 = vrot.lane.b32.xlu1 %v2307_v28, %s2192_s17 }
 0x21a   :  { %227 = vrot.lane.b32.xlu1 %v2307_v28, %s2194_s19 }
 0x21e   :  { %306 = vrot.lane.b32.xlu1 %v2307_v28, %s2195_s20 }
 0x280   :  { %v2316_v29 = vpop.permute.xlu0 %221  ;;  %v2318_v30 = vpop.permute.xlu1 %217 }
 0x281   :  { %382 = vrot.lane.b32.xlu0 %v2318_v30, %s2195_s20 }
 0x284   :  { %v2321_v31 = vpop.permute.xlu0 %225  ;;  %v2323_v32 = vpop.permute.xlu1 %219 }
 0x285   :  { %534 = vrot.lane.b32.xlu0 %v2316_v29, %s2195_s20  ;;  %458 = vrot.lane.b32.xlu1 %v2323_v32, %s2195_s20 }
 0x288   :  { %v230_v33 = vpop.permute.xlu0 %229  ;;  %v2327_v34 = vpop.permute.xlu1 %223 }
 0x289   :  { %2008 = vmatpush3.xpose.msk.msra.mxu1 %vm231_vm5, %v230_v33  ;;  %686 = vrot.lane.b32.xlu0 %v2321_v31, %s2195_s20 }
 0x28a   :  { %610 = vrot.lane.b32.xlu1 %v2327_v34, %s2195_s20  ;;  %2012 = vmatprep.subr.mxu1 %v2190_v13 }
 0x28c   :  { %2010 = vmatmul.mubr.msk.f32.vlgmr.msra.gmra.mxu1 %vm231_vm5, %v2301_v27  ;;  %v2335_v35 = vpop.permute.xlu1 %227 }
 0x28d   :  { %2014 = vmatprep.mubr.msk.f32.mxu1 %vm2191_vm4, %v2190_v13 }
 0x28e   :  { %762 = vrot.lane.b32.xlu1 %v2335_v35, %s2195_s20 }
 0x290   :  { %v307_v36 = vpop.permute.xlu1 %306 }
 0x291   :  { %2013 = vmatpush3.xpose.msk.msra.mxu1 %vm231_vm5, %v307_v36 }
 0x292   :  { %2022 = vmatprep.subr.mxu1 %v2190_v13 }
 0x294   :  { %2015 = vmatmul.mubr.msk.f32.vlgmr.msra.gmra.mxu1 %vm231_vm5, %v2307_v28 }
 0x295   :  { %2024 = vmatprep.mubr.msk.f32.mxu1 %vm2191_vm4, %v2190_v13 }
 0x2f3   :  { %v383_v37 = vpop.permute.xlu0 %382 }
 0x2f4   :  { %2018 = vmatpush3.xpose.msk.msra.mxu0 %vm231_vm5, %v383_v37 }
 0x2f5   :  { %2027 = vmatprep.subr.mxu0 %v2190_v13 }
 0x2f7   :  { %2020 = vmatmul.mubr.msk.f32.vlgmr.msra.gmra.mxu0 %vm231_vm5, %v2318_v30  ;;  %v535_v38 = vpop.permute.xlu0 %534  ;;  %v459_v39 = vpop.permute.xlu1 %458 }
 0x2f8   :  { %2023 = vmatpush3.xpose.msk.msra.mxu1 %vm231_vm5, %v459_v39  ;;  %2028 = vmatpush3.xpose.msk.msra.mxu0 %vm231_vm5, %v535_v38 }
 0x2f9   :  { %2029 = vmatprep.mubr.msk.f32.mxu0 %vm2191_vm4, %v2190_v13  ;;  %2037 = vmatprep.subr.mxu0 %v2190_v13 }
 0x2fa   :  { %2032 = vmatprep.subr.mxu1 %v2190_v13 }
 0x2fb   :  { %2030 = vmatmul.mubr.msk.f32.vlgmr.msra.gmra.mxu0 %vm231_vm5, %v2316_v29  ;;  %v687_v40 = vpop.permute.xlu0 %686  ;;  %2025 = vmatmul.mubr.msk.f32.vlgmr.msra.gmra.mxu1 %vm231_vm5, %v2323_v32 }
 0x2fc   :  { %v611_v41 = vpop.permute.xlu1 %610  ;;  %2038 = vmatpush3.xpose.msk.msra.mxu0 %vm231_vm5, %v687_v40  ;;  %2034 = vmatprep.mubr.msk.f32.mxu1 %vm2191_vm4, %v2190_v13 }
 0x2fd   :  { %2033 = vmatpush3.xpose.msk.msra.mxu1 %vm231_vm5, %v611_v41  ;;  %2039 = vmatprep.mubr.msk.f32.mxu0 %vm2191_vm4, %v2190_v13 }
 0x2fe   :  { %2042 = vmatprep.subr.mxu1 %v2190_v13  ;;  %2047 = vmatprep.subr.mxu0 %v2190_v13 }
 0x2ff   :  { %2040 = vmatmul.mubr.msk.f32.vlgmr.msra.gmra.mxu0 %vm231_vm5, %v2321_v31 }
 0x300   :  { %2035 = vmatmul.mubr.msk.f32.vlgmr.msra.gmra.mxu1 %vm231_vm5, %v2327_v34  ;;  %v763_v42 = vpop.permute.xlu1 %762  ;;  %2049 = vmatprep.mubr.msk.f32.mxu0 %vm2191_vm4, %v2190_v13 }
 0x301   :  { %2043 = vmatpush3.xpose.msk.msra.mxu1 %vm231_vm5, %v763_v42  ;;  %2044 = vmatprep.mubr.msk.f32.mxu1 %vm2191_vm4, %v2190_v13 }
 0x302   :  { %2052 = vmatprep.subr.mxu1 %v2190_v13 }
 0x304   :  { %2045 = vmatmul.mubr.msk.f32.vlgmr.msra.gmra.mxu1 %vm231_vm5, %v2335_v35 }
 0x305   :  { %2054 = vmatprep.mubr.msk.f32.mxu1 %vm2191_vm4, %v2190_v13 }
 0x34c   :  { %v302_v43 = vpop.f32.mrf.mxu1 }
 0x34d   :  { %v838_v44 = vsel %vm231_vm5, %v302_v43, -inf }
 0x34e   :  { %v2011_v45 = vpop.f32.mrf.mxu1  ;;  %839 = vmax.xlane.f32.xlu0 %v838_v44 }
 0x354   :  { %v378_v46 = vpop.f32.mrf.mxu1 }
 0x355   :  { %v841_v47 = vsel %vm231_vm5, %v378_v46, -inf }
 0x356   :  { %842 = vmax.xlane.f32.xlu1 %v841_v47  ;;  %v2016_v48 = vpop.f32.mrf.mxu1 }
 0x3b7   :  { %v454_v49 = vpop.f32.mrf.mxu0 }
 0x3b8   :  { %v844_v50 = vsel %vm231_vm5, %v454_v49, -inf }
 0x3b9   :  { %845 = vmax.xlane.f32.xlu0 %v844_v50  ;;  %v2021_v51 = vpop.f32.mrf.mxu0 }
 0x3bb   :  { %v530_v52 = vpop.f32.mrf.mxu1  ;;  %v606_v53 = vpop.f32.mrf.mxu0 }
 0x3bc   :  { %v850_v54 = vsel %vm231_vm5, %v606_v53, -inf  ;;  %v847_v55 = vsel %vm231_vm5, %v530_v52, -inf }
 0x3bd   :  { %v2031_v56 = vpop.f32.mrf.mxu0  ;;  %851 = vmax.xlane.f32.xlu1 %v850_v54  ;;  %848 = vmax.xlane.f32.xlu0 %v847_v55  ;;  %v2026_v57 = vpop.f32.mrf.mxu1 }
 0x3bf   :  { %v2387_v58 = vpop.f32.mrf.mxu0 }
 0x3c0   :  { %v682_v59 = vpop.f32.mrf.mxu1  ;;  %v856_v5 = vsel %vm231_vm5, %v2387_v58, -inf }
 0x3c1   :  { %v2041_v60 = vpop.f32.mrf.mxu0  ;;  %v853_v61 = vsel %vm231_vm5, %v682_v59, -inf }
 0x3c2   :  { %854 = vmax.xlane.f32.xlu0 %v853_v61  ;;  %v2036_v62 = vpop.f32.mrf.mxu1 }
 0x3c4   :  { %v834_v63 = vpop.f32.mrf.mxu1 }
 0x3c5   :  { %v859_v0 = vsel %vm231_vm5, %v834_v63, -inf }
 0x3c6   :  { %860 = vmax.xlane.f32.xlu0 %v859_v0  ;;  %v2046_v1 = vpop.f32.mrf.mxu1 }
 0x3ce   :  { %950 = vrot.lane.b32.xlu1 %v2301_v27, %s2196_s21 }
 0x3d2   :  { %1102 = vrot.lane.b32.xlu1 %v2318_v30, %s2196_s21 }
 0x3d7   :  { %v840_v10 = vpop.xlane.xlu0 %839 }
 0x3d8   :  { %v862_v11 = vsub.f32 %v302_v43, %v840_v10 }
 0x3da   :  { %v870_v12 = vmul.f32 1.442695, %v862_v11 }
 0x3dc   :  { %1026 = vrot.lane.b32.xlu0 %v2307_v28, %s2196_s21 }
 0x3df   :  { %v843_v2 = vpop.xlane.xlu1 %842 }
 0x3e0   :  { %v863_v3 = vsub.f32 %v378_v46, %v843_v2 }
 0x3e2   :  { %v872_v4 = vmul.f32 1.442695, %v863_v3 }
 0x3e4   :  { %2123 = vpow2.f32 %v872_v4 }
 0x3e5   :  { %2125 = vpow2.f32 %v870_v12 }
 0x3f1   :  { %v2399_v6 = vpop.eup %2123 }
 0x3f2   :  { %v889_v9 = vsel %vm231_vm5, %v2399_v6, 0.0  ;;  %v2405_v14 = vpop.eup %2125 }
 0x3f3   :  { %v886_v15 = vsel %vm231_vm5, %v2405_v14, 0.0 }
 0x3f6   :  { %857 = vmax.xlane.f32.xlu1 %v856_v5 }
 0x3fb   :  { %890 = vadd.xlane.f32.xlu0 %v889_v9 }
 0x407   :  { %1178 = vrot.lane.b32.xlu1 %v2323_v32, %s2196_s21 }
 0x42b   :  { %887 = vadd.xlane.f32.xlu1 %v886_v15 }
 0x442   :  { %v846_v16 = vpop.xlane.xlu0 %845 }
 0x443   :  { %v864_v17 = vsub.f32 %v454_v49, %v846_v16 }
 0x445   :  { %v874_v18 = vmul.f32 1.442695, %v864_v17 }
 0x446   :  { %v849_v19 = vpop.xlane.xlu0 %848  ;;  %v852_v22 = vpop.xlane.xlu1 %851 }
 0x447   :  { %2127 = vpow2.f32 %v874_v18  ;;  %v865_v23 = vsub.f32 %v530_v52, %v849_v19  ;;  %v866_v24 = vsub.f32 %v606_v53, %v852_v22 }
 0x449   :  { %v876_v26 = vmul.f32 1.442695, %v865_v23  ;;  %v878_v27 = vmul.f32 1.442695, %v866_v24 }
 0x44a   :  { %v951_v28 = vpop.permute.xlu1 %950 }
 0x44b   :  { %2129 = vpow2.f32 %v876_v26  ;;  %v855_v30 = vpop.xlane.xlu0 %854  ;;  %2048 = vmatpush3.msra.mxu0 %v951_v28 }
 0x44c   :  { %2131 = vpow2.f32 %v878_v27  ;;  %v867_v32 = vsub.f32 %v682_v59, %v855_v30  ;;  %2057 = vmatprep.subr.mxu0 %v2190_v13 }
 0x44e   :  { %v880_v33 = vmul.f32 1.442695, %v867_v32  ;;  %v1103_v50 = vpop.permute.xlu1 %1102 }
 0x44f   :  { %v861_v36 = vpop.xlane.xlu0 %860 }
 0x450   :  { %2133 = vpow2.f32 %v880_v33  ;;  %v869_v37 = vsub.f32 %v834_v63, %v861_v36 }
 0x452   :  { %v884_v38 = vmul.f32 1.442695, %v869_v37 }
 0x453   :  { %v1027_v39 = vpop.permute.xlu0 %1026 }
 0x454   :  { %v2410_v40 = vpop.eup %2127  ;;  %2135 = vpow2.f32 %v884_v38  ;;  %2053 = vmatpush3.msra.mxu1 %v1027_v39 }
 0x455   :  { %v892_v41 = vsel %vm231_vm5, %v2410_v40, 0.0  ;;  %2062 = vmatprep.subr.mxu1 %v2190_v13 }
 0x456   :  { %893 = vadd.xlane.f32.xlu1 %v892_v41 }
 0x458   :  { %v2415_v42 = vpop.eup %2129 }
 0x459   :  { %v2417_v43 = vpop.eup %2131  ;;  %v895_v44 = vsel %vm231_vm5, %v2415_v42, 0.0 }
 0x45a   :  { %896 = vadd.xlane.f32.xlu0 %v895_v44  ;;  %v898_v45 = vsel %vm231_vm5, %v2417_v43, 0.0 }
 0x45b   :  { %899 = vadd.xlane.f32.xlu1 %v898_v45 }
 0x45d   :  { %v2423_v46 = vpop.eup %2133 }
 0x45e   :  { %v901_v47 = vsel %vm231_vm5, %v2423_v46, 0.0 }
 0x45f   :  { %902 = vadd.xlane.f32.xlu0 %v901_v47 }
 0x461   :  { %v2427_v48 = vpop.eup %2135 }
 0x462   :  { %v907_v49 = vsel %vm231_vm5, %v2427_v48, 0.0 }
 0x463   :  { %908 = vadd.xlane.f32.xlu0 %v907_v49 }
 0x46c   :  { %1330 = vrot.lane.b32.xlu1 %v2327_v34, %s2196_s21 }
 0x479   :  { %1254 = vrot.lane.b32.xlu0 %v2316_v29, %s2196_s21 }
 0x47d   :  { %1406 = vrot.lane.b32.xlu0 %v2321_v31, %s2196_s21 }
 0x47f   :  { %v858_v51 = vpop.xlane.xlu1 %857 }
 0x480   :  { %v868_v52 = vsub.f32 %v2387_v58, %v858_v51 }
 0x481   :  { %1610 = vrot.lane.b32.xlu0 %v2248_v7, %s2197_s22 }
 0x482   :  { %v882_v53 = vmul.f32 1.442695, %v868_v52 }
 0x483   :  { %v1179_v31 = vpop.permute.xlu1 %1178 }
 0x484   :  { %2137 = vpow2.f32 %v882_v53  ;;  %v891_v54 = vpop.xlane.xlu0 %890 }
 0x485   :  { %2139 = vrcp.f32 %v891_v54 }
 0x491   :  { %v2438_v55 = vpop.eup %2137 }
 0x492   :  { %v2140_v56 = vpop.eup %2139  ;;  %v904_v34 = vsel %vm231_vm5, %v2438_v55, 0.0 }
 0x493   :  { %v919_v57 = vmul.f32 %v2140_v56, %v891_v54  ;;  %905 = vadd.xlane.f32.xlu1 %v904_v34 }
 0x495   :  { %v927_v29 = vsub.f32 2.0, %v919_v57 }
 0x497   :  { %v935_v59 = vmul.f32 %v2140_v56, %v927_v29 }
 0x499   :  { %v943_v60 = vmul.f32 %v2399_v6, %v935_v59 }
 0x49b   :  { %2055 = vmatmul.mubr.msk.f32.vlgmr.msra.gmra.mxu1 %vm231_vm5, %v943_v60 }
 0x49c   :  { %2063 = vmatpush3.msra.mxu1 %v1179_v31  ;;  %2064 = vmatprep.mubr.msk.f32.mxu1 %vm2191_vm4, %v2190_v13 }
 0x49d   :  { %2072 = vmatprep.subr.mxu1 %v2190_v13 }
 0x4a4   :  { %1482 = vrot.lane.b32.xlu1 %v2335_v35, %s2196_s21 }
 0x4a8   :  { %1608 = vrot.lane.b32.xlu1 %v2254_v8, %s2197_s22 }
 0x4ac   :  { %1606 = vrot.lane.b32.xlu1 %v2277_v20, %s2197_s22 }
 0x4b4   :  { %v888_v58 = vpop.xlane.xlu1 %887 }
 0x4b5   :  { %2141 = vrcp.f32 %v888_v58 }
 0x4c2   :  { %v2142_v61 = vpop.eup %2141 }
 0x4c3   :  { %v918_v62 = vmul.f32 %v2142_v61, %v888_v58 }
 0x4c5   :  { %v926_v63 = vsub.f32 2.0, %v918_v62 }
 0x4c7   :  { %v934_v0 = vmul.f32 %v2142_v61, %v926_v63  ;;  %v1703_v61 = vld [vmem:[%s2527_s2 + $0x38] sm:$0xff] }
 0x4c9   :  { %v942_v1 = vmul.f32 %v2405_v14, %v934_v0 }
 0x4cb   :  { %2050 = vmatmul.mubr.msk.f32.vlgmr.msra.gmra.mxu0 %vm231_vm5, %v942_v1 }
 0x4cc   :  { %2058 = vmatpush3.msra.mxu0 %v1103_v50  ;;  %2059 = vmatprep.mubr.msk.f32.mxu0 %vm2191_vm4, %v2190_v13 }
 0x4cd   :  { %2067 = vmatprep.subr.mxu0 %v2190_v13 }
 0x4df   :  { %v894_v2 = vpop.xlane.xlu1 %893 }
 0x4e0   :  { %2143 = vrcp.f32 %v894_v2 }
 0x4e3   :  { %v897_v3 = vpop.xlane.xlu0 %896 }
 0x4e4   :  { %2145 = vrcp.f32 %v897_v3  ;;  %v900_v35 = vpop.xlane.xlu1 %899 }
 0x4e5   :  { %2147 = vrcp.f32 %v900_v35 }
 0x4e8   :  { %v903_v4 = vpop.xlane.xlu0 %902  ;;  %v1331_v33 = vpop.permute.xlu1 %1330 }
 0x4e9   :  { %2149 = vrcp.f32 %v903_v4 }
 0x4ec   :  { %v909_v9 = vpop.xlane.xlu0 %908 }
 0x4ed   :  { %v2144_v5 = vpop.eup %2143  ;;  %2151 = vrcp.f32 %v909_v9 }
 0x4ee   :  { %v920_v6 = vmul.f32 %v2144_v5, %v894_v2 }
 0x4f0   :  { %v928_v10 = vsub.f32 2.0, %v920_v6  ;;  %v1255_v22 = vpop.permute.xlu0 %1254 }
 0x4f1   :  { %v2146_v11 = vpop.eup %2145 }
 0x4f2   :  { %v2148_v12 = vpop.eup %2147  ;;  %v936_v14 = vmul.f32 %v2144_v5, %v928_v10  ;;  %v921_v15 = vmul.f32 %v2146_v11, %v897_v3 }
 0x4f3   :  { %v922_v16 = vmul.f32 %v2148_v12, %v900_v35 }
 0x4f4   :  { %v944_v17 = vmul.f32 %v2410_v40, %v936_v14  ;;  %v929_v18 = vsub.f32 2.0, %v921_v15  ;;  %v1407_v37 = vpop.permute.xlu0 %1406  ;;  %v1701_v14 = vld [vmem:[%s2527_s2 + $0x18] sm:$0xff]  ;;  %v1700_v15 = vld [vmem:[%s2527_s2 + $0x8] sm:$0xff] }
 0x4f5   :  { %v930_v19 = vsub.f32 2.0, %v922_v16  ;;  %v1914_v16 = vld [vmem:[%s2528_s3 + $0x1] ss:$0 sm:$0xff] }
 0x4f6   :  { %v2150_v23 = vpop.eup %2149  ;;  %v937_v24 = vmul.f32 %v2146_v11, %v929_v18  ;;  %2060 = vmatmul.mubr.msk.f32.vlgmr.msra.gmra.mxu0 %vm231_vm5, %v944_v17 }
 0x4f7   :  { %v938_v26 = vmul.f32 %v2148_v12, %v930_v19  ;;  %v923_v27 = vmul.f32 %v2150_v23, %v903_v4  ;;  %2068 = vmatpush3.msra.mxu0 %v1255_v22  ;;  %2069 = vmatprep.mubr.msk.f32.mxu0 %vm2191_vm4, %v2190_v13  ;;  %v1702_v12 = vld [vmem:[%s2527_s2 + $0x28] sm:$0xff]  ;;  %s2201_s2 = smov [#allocation2]  }
 0x4f8   :  { %v945_v28 = vmul.f32 %v2415_v42, %v937_v24  ;;  %2077 = vmatprep.subr.mxu0 %v2190_v13  ;;  %v1611_v51 = vpop.permute.xlu0 %1610  ;;  %s1874_s3 = sshll.u32 %s2201_s2, 4  ;;  %s1875_s3 = int_to_ptr.vmem [resolvable:$true] %s1874_s3 }
 0x4f9   :  { %v946_v30 = vmul.f32 %v2417_v43, %v938_v26  ;;  %v931_v32 = vsub.f32 2.0, %v923_v27  ;;  %s2167_s9 = scalar_lea.vmem %s1875_s3, 32  ;;  %p2172_p1 = scmp.lt.s32.totalorder %s1875_s3, %s1875_s3 }
 0x4fa   :  { %2065 = vmatmul.mubr.msk.f32.vlgmr.msra.gmra.mxu1 %vm231_vm5, %v945_v28  ;;  %v2152_v39 = vpop.eup %2151  ;;  %p2168_p0 = scmp.ne.s32.totalorder %s1875_s3, %s2167_s9  ;;  %p2173_p2 = scmp.lt.s32.totalorder %s2167_s9, %s2167_s9 }
 0x4fb   :  { %v939_v36 = vmul.f32 %v2150_v23, %v931_v32  ;;  %2070 = vmatmul.mubr.msk.f32.vlgmr.msra.gmra.mxu0 %vm231_vm5, %v946_v30  ;;  %2073 = vmatpush3.msra.mxu1 %v1331_v33  ;;  %v925_v40 = vmul.f32 %v2152_v39, %v909_v9 }
 0x4fc   :  { %2078 = vmatpush3.msra.mxu0 %v1407_v37  ;;  %2074 = vmatprep.mubr.msk.f32.mxu1 %vm2191_vm4, %v2190_v13  ;;  %p2174_p3 = por %p2173_p2, %p2172_p1 }
 0x4fd   :  { %v947_v38 = vmul.f32 %v2423_v46, %v939_v36  ;;  %2082 = vmatprep.subr.mxu1 %v2190_v13  ;;  %2079 = vmatprep.mubr.msk.f32.mxu0 %vm2191_vm4, %v2190_v13  ;;  %v933_v41 = vsub.f32 2.0, %v925_v40 }
 0x4fe   :  { %2087 = vmatprep.subr.mxu0 %v1611_v51  ;;  %p2175_p4 = pnand %p2174_p3, %p2168_p0 }
 0x4ff   :  { %2075 = vmatmul.mubr.msk.f32.vlgmr.msra.gmra.mxu1 %vm231_vm5, %v947_v38  ;;  %v941_v42 = vmul.f32 %v2152_v39, %v933_v41 }
 0x500   :  { %2084 = vmatprep.mubr.msk.f32.mxu1 %vm2191_vm4, %v2190_v13 }
 0x501   :  { %v949_v44 = vmul.f32 %v2427_v48, %v941_v42 }
 0x51c   :  { %v906_v43 = vpop.xlane.xlu1 %905 }
 0x51d   :  { %2153 = vrcp.f32 %v906_v43 }
 0x520   :  { %v1483_v13 = vpop.permute.xlu1 %1482 }
 0x521   :  { %2083 = vmatpush3.msra.mxu1 %v1483_v13 }
 0x522   :  { %2085 = vmatmul.mubr.msk.f32.vlgmr.msra.gmra.mxu1 %vm231_vm5, %v949_v44  ;;  %2098 = vmatprep.subr.mxu1 %v1703_v61 }
 0x523   :  { %2099 = vmatpush3.msra.mxu1 %v1703_v61 }
 0x524   :  { %v1609_v50 = vpop.permute.xlu1 %1608  ;;  %2100 = vmatprep.subr.mxu1 %v1702_v12 }
 0x525   :  { %2101 = vmatpush3.msra.mxu1 %v1702_v12 }
 0x526   :  { %2102 = vmatprep.subr.mxu1 %v1701_v14 }
 0x527   :  { %2103 = vmatpush3.msra.mxu1 %v1701_v14 }
 0x528   :  { %v1607_v48 = vpop.permute.xlu1 %1606  ;;  %2104 = vmatprep.subr.mxu1 %v1700_v15 }
 0x529   :  { %2105 = vmatpush3.msra.mxu1 %v1700_v15 }
 0x52a   :  { %v2154_v45 = vpop.eup %2153 }
 0x52b   :  { %v924_v8 = vmul.f32 %v2154_v45, %v906_v43 }
 0x52d   :  { %v932_v46 = vsub.f32 2.0, %v924_v8 }
 0x52f   :  { %v940_v47 = vmul.f32 %v2154_v45, %v932_v46 }
 0x531   :  { %v948_v7 = vmul.f32 %v2438_v55, %v940_v47 }
 0x533   :  { %2080 = vmatmul.mubr.msk.f32.vlgmr.msra.gmra.mxu0 %vm231_vm5, %v948_v7 }
 0x534   :  { %2088 = vmatpush3.msra.mxu0 %v1611_v51 }
 0x535   :  { %2089 = vmatprep.subr.mxu0 %v1609_v50 }
 0x536   :  { %2090 = vmatpush3.msra.mxu0 %v1609_v50 }
 0x537   :  { %2091 = vmatprep.subr.mxu0 %v1607_v48 }
 0x538   :  { %2092 = vmatpush3.msra.mxu0 %v1607_v48 }
 0x55b   :  { %v1098_v20 = vpop.f32.mrf.mxu1 }
 0x55d   :  { %v2056_v49 = vpop.f32.mrf.mxu1 }
 0x58b   :  { %v1022_v52 = vpop.f32.mrf.mxu0 }
 0x58d   :  { %v2051_v53 = vpop.f32.mrf.mxu0 }
 0x5b6   :  { %v1174_v54 = vpop.f32.mrf.mxu0 }
 0x5b8   :  { %v2061_v56 = vpop.f32.mrf.mxu0 }
 0x5ba   :  { %v1250_v34 = vpop.f32.mrf.mxu1 }
 0x5bb   :  { %v1326_v57 = vpop.f32.mrf.mxu0  ;;  %1562 = vrot.lane.b32.xlu0 %v1250_v34, %s2198_s23 }
 0x5bc   :  { %1568 = vrot.lane.b32.xlu1 %v1326_v57, %s2199_s24  ;;  %v2066_v55 = vpop.f32.mrf.mxu1 }
 0x5bd   :  { %v2071_v29 = vpop.f32.mrf.mxu0 }
 0x5bf   :  { %v1402_v59 = vpop.f32.mrf.mxu1  ;;  %1560 = vrot.lane.b32.xlu0 %v1174_v54, %s2198_s23 }
 0x5c1   :  { %v2076_v60 = vpop.f32.mrf.mxu1 }
 0x5c3   :  { %1570 = vrot.lane.b32.xlu0 %v1402_v59, %s2199_s24 }
 0x5c7   :  { %1604 = vrot.lane.b32.xlu0 %v2284_v21, %s2197_s22 }
 0x5cb   :  { %1616 = vrot.lane.b32.xlu0 %v2294_v25, %s2197_s22 }
 0x5e2   :  { %v1554_v31 = vpop.f32.mrf.mxu1 }
 0x5e4   :  { %v2086_v58 = vpop.f32.mrf.mxu1 }
 0x5f3   :  { %v1478_v62 = vpop.f32.mrf.mxu0 }
 0x5f4   :  { %1576 = vrot.lane.b32.xlu1 %v1478_v62, %s2200_s27 }
 0x5f5   :  { %v2081_v63 = vpop.f32.mrf.mxu0 }
 0x5f8   :  { %1578 = vrot.lane.b32.xlu1 %v1554_v31, %s2200_s27 }
 0x5fc   :  { %1794 = vrot.lane.b32.xlu1 %v1914_v16, %s2192_s17 }
 0x62d   :  { %v1563_v0 = vpop.permute.xlu0 %1562 }
 0x62e   :  { %v1569_v25 = vpop.permute.xlu1 %1568  ;;  %v1583_v6 = vsel %vm231_vm5, %v1098_v20, %v1563_v0 }
 0x631   :  { %v1561_v1 = vpop.permute.xlu0 %1560 }
 0x632   :  { %v1582_v3 = vsel %vm231_vm5, %v1022_v52, %v1561_v1 }
 0x633   :  { %v1585_v35 = vsel %vm1584_vm6, %v1582_v3, %v1569_v25 }
 0x635   :  { %v1571_v2 = vpop.permute.xlu0 %1570 }
 0x636   :  { %v1586_v9 = vsel %vm1584_vm6, %v1583_v6, %v1571_v2 }
 0x639   :  { %v1605_v21 = vpop.permute.xlu0 %1604 }
 0x63a   :  { %2093 = vmatprep.subr.mxu0 %v1605_v21 }
 0x63b   :  { %2094 = vmatpush3.msra.mxu0 %v1605_v21 }
 0x63d   :  { %v1617_v18 = vpop.permute.xlu0 %1616 }
 0x666   :  { %v1577_v4 = vpop.permute.xlu1 %1576 }
 0x667   :  { %v1588_v5 = vsel %vm1587_vm7, %v1585_v35, %v1577_v4 }
 0x668   :  { %2095 = vmatprep.mubr.msk.f32.mxu0 %vm133_vm3, %v1588_v5 }
 0x66a   :  { %v1579_v10 = vpop.permute.xlu1 %1578 }
 0x66b   :  { %v1589_v11 = vsel %vm1587_vm7, %v1586_v9, %v1579_v10 }
 0x66c   :  { %2096 = vmatmul.mubr.msk.f32.vlgmr.msra.gmra.mxu0 %vm133_vm3, %v1589_v11 }
 0x66e   :  { %v1795_v30 = vpop.permute.xlu1 %1794 }
 0x72c   :  { %v2097_v17 = vpop.f32.mrf.mxu0 }
 0x72d   :  { %v2510_v23 = vadd.f32 %v2097_v17, %v1617_v18 }
 0x72e   :  { %v1691_v19 = vpop.f32.mrf.mxu0 }
 0x72f   :  { %v2508_v22 = vadd.f32 %v1691_v19, %v1617_v18 }
 0x731   :  { %2106 = vmatprep.mubr.msk.f32.mxu1 %vm133_vm3, %v2508_v22 }
 0x732   :  { %2107 = vmatmul.mubr.msk.f32.vlgmr.msra.gmra.mxu1 %vm133_vm3, %v2510_v23 }
 0x7f2   :  { %v2108_v24 = vpop.f32.mrf.mxu1 }
 0x7f3   :  { %v1789_v26 = vadd.f32 %v2108_v24, %v1914_v16 }
 0x7f4   :  { %v1783_v27 = vpop.f32.mrf.mxu1 }
 0x7f5   :  { %2155 = vtanh.f32 %v1789_v26  ;;  %v1784_v28 = vadd.f32 %v1914_v16, %v1783_v27 }
 0x7f7   :  { %2157 = vtanh.f32 %v1784_v28 }
 0x802   :  { %v2156_v32 = vpop.eup %2155 }
 0x803   :  { %v1798_v33 = vmul.f32 %v2156_v32, %v1795_v30 }
 0x804   :  { %v2158_v36 = vpop.eup %2157 }
 0x805   :  { %v1797_v37 = vmul.f32 %v2158_v36, %v1795_v30  ;;  %v1802_v38 = vsel %vm1584_vm6, %v1798_v33, 0.0 }
 0x806   :  { %1803 = vadd.xlane.f32.xlu1 %v1802_v38 }
 0x807   :  { %v1799_v39 = vsel %vm1584_vm6, %v1797_v37, 0.0 }
 0x808   :  { %1800 = vadd.xlane.f32.xlu0 %v1799_v39 }
 0x88f   :  { %v1804_v40 = vpop.xlane.xlu1 %1803 }
 0x890   :  { %v1811_v41 = vrot.slane %v1804_v40, 4 }
 0x891   :  { %v1801_v42 = vpop.xlane.xlu0 %1800 }
 0x892   :  { %v1812_v43 = vmax.f32 %v1804_v40, %v1811_v41  ;;  %v1805_v44 = vrot.slane %v1801_v42, 4 }
 0x894   :  { %v1813_v13 = vrot.slane %v1812_v43, 2  ;;  %v1806_v45 = vmax.f32 %v1801_v42, %v1805_v44 }
 0x896   :  { %v1814_v8 = vmax.f32 %v1812_v43, %v1813_v13  ;;  %v1807_v46 = vrot.slane %v1806_v45, 2 }
 0x898   :  { %v1815_v47 = vrot.slane %v1814_v8, 1  ;;  %v1808_v7 = vmax.f32 %v1806_v45, %v1807_v46 }
 0x89a   :  { %v1816_v20 = vmax.f32 %v1814_v8, %v1815_v47  ;;  %v1809_v49 = vrot.slane %v1808_v7, 1 }
 0x89c   :  { %v1818_v50 = vsub.f32 %v1804_v40, %v1816_v20  ;;  %v1810_v51 = vmax.f32 %v1808_v7, %v1809_v49 }
 0x89e   :  { %v1821_v48 = vmul.f32 1.442695, %v1818_v50  ;;  %v1817_v52 = vsub.f32 %v1801_v42, %v1810_v51 }
 0x8a0   :  { %2159 = vpow2.f32 %v1821_v48  ;;  %v1819_v53 = vmul.f32 1.442695, %v1817_v52 }
 0x8a2   :  { %2161 = vpow2.f32 %v1819_v53 }
 0x8ad   :  { %v2160_v54 = vpop.eup %2159 }
 0x8ae   :  { %v1829_v56 = vrot.slane %v2160_v54, 4 }
 0x8af   :  { %v2162_v34 = vpop.eup %2161 }
 0x8b0   :  { %v1823_v57 = vrot.slane %v2162_v34, 4  ;;  %v1830_v55 = vadd.f32 %v2160_v54, %v1829_v56 }
 0x8b2   :  { %v1824_v29 = vadd.f32 %v2162_v34, %v1823_v57  ;;  %v1831_v59 = vrot.slane %v1830_v55, 2 }
 0x8b4   :  { %v1825_v60 = vrot.slane %v1824_v29, 2  ;;  %v1832_v31 = vadd.f32 %v1831_v59, %v1830_v55 }
 0x8b6   :  { %v1826_v58 = vadd.f32 %v1825_v60, %v1824_v29  ;;  %v1833_v61 = vrot.slane %v1832_v31, 1 }
 0x8b8   :  { %v1827_v62 = vrot.slane %v1826_v58, 1  ;;  %v1834_v63 = vadd.f32 %v1833_v61, %v1832_v31 }
 0x8ba   :  { %v1828_v0 = vadd.f32 %v1827_v62, %v1826_v58  ;;  %2163 = vrcp.f32 %v1834_v63 }
 0x8bc   :  { %2165 = vrcp.f32 %v1828_v0 }
 0x8c7   :  { %v2164_v1 = vpop.eup %2163 }
 0x8c8   :  { %v1838_v2 = vmul.f32 %v2164_v1, %v1834_v63 }
 0x8c9   :  { %v2166_v21 = vpop.eup %2165 }
 0x8ca   :  { %v1837_v25 = vmul.f32 %v2166_v21, %v1828_v0  ;;  %v1840_v3 = vsub.f32 2.0, %v1838_v2 }
 0x8cc   :  { %v1839_v35 = vsub.f32 2.0, %v1837_v25  ;;  %v1842_v4 = vmul.f32 %v2164_v1, %v1840_v3 }
 0x8ce   :  { %v1841_v5 = vmul.f32 %v2166_v21, %v1839_v35  ;;  %v1844_v6 = vmul.f32 %v2160_v54, %v1842_v4 }
 0x8d0   :  { %v1843_v9 = vmul.f32 %v2162_v34, %v1841_v5  ;;  %v1846_v10 = vmul.f32 %v1844_v6, %v2510_v23 }
 0x8d2   :  { %v1845_v11 = vmul.f32 %v1843_v9, %v2508_v22  ;;  %v1854_v12 = vsel %vm133_vm3, %v1846_v10, 0.0 }
 0x8d3   :  { %v1855_v14 = vrot.slane %v1854_v12, 4 }
 0x8d4   :  { %v1847_v15 = vsel %vm133_vm3, %v1845_v11, 0.0 }
 0x8d5   :  { %v1848_v16 = vrot.slane %v1847_v15, 4  ;;  %v1856_v17 = vadd.f32 %v1855_v14, %v1854_v12 }
 0x8d7   :  { %v1849_v18 = vadd.f32 %v1848_v16, %v1847_v15  ;;  %v1857_v19 = vrot.slane %v1856_v17, 2 }
 0x8d9   :  { %v1850_v24 = vrot.slane %v1849_v18, 2  ;;  %v1858_v26 = vadd.f32 %v1857_v19, %v1856_v17 }
 0x8db   :  { %v1851_v27 = vadd.f32 %v1850_v24, %v1849_v18  ;;  %v1859_v28 = vrot.slane %v1858_v26, 1 }
 0x8dd   :  { %v1852_v30 = vrot.slane %v1851_v27, 1  ;;  %v1860_v32 = vadd.f32 %v1859_v28, %v1858_v26 }
 0x8df   :  { %v1853_v23 = vadd.f32 %v1852_v30, %v1851_v27 }
 0x8e1   :  { %v1864_v22 = vsel %vm1863_vm8, %v1860_v32, %v1853_v23 }
 0x8e2   :  { %1867 = vst.msk [vmem:[#allocation2] sm:$0x3] %vm1866_vm9, %v1864_v22 }
 0x8e3   :  { %2178 = shalt.err (!%p2175_p4)
}
 0x8e4   :  { %1877 = dma.vmem_to_hbm [thread:$0]  %s1875_s3, 32, %s2529_s4, [#allocation3]  }
 0x8e5   :  { %2187 = dma.done.wait [#allocation3], 32  }
 0x8e6   :  { %2188 = vsyncadd [#allocation3], 4294967264 }
 0x8e7   :  { %1881 = vsyncpa [#allocation3], 1 }

</bundles_post_ra>
